<compile_context>
chip_gen: v7x
topology: tpu7x:2x2x1
jax: 0.10.0
libtpu: 0.0.40
codegen_flags: <defaults>
</compile_context>

<pallas_src>
import math
import jax
import jax.numpy as jnp
from jax import lax
from jax.experimental import pallas as pl
from jax.experimental.pallas import tpu as pltpu


def _feature_adapter_kernel(x_ref, pt_ref, wt_ref, b_ref, o_ref, w_scr, acc_scr, *, num_head):
    h = pl.program_id(1)
    x = x_ref[...]                                     # [tm, Dp], input dtype (bf16 stays bf16 on MXU)

    # ---- once per row tile: cosine-softmax head weights + residual accumulator init -------
    @pl.when(h == 0)
    def _():
        xf = x.astype(jnp.float32)
        # Prototypes are pre-normalized and pre-scaled by 1/T in the wrapper; padded lanes are
        # zero, so padded (all-zero) rows / extra lanes produce exactly-zero logits.
        s = jnp.dot(x, pt_ref[...], preferred_element_type=jnp.float32)           # [tm, Hc]
        x_inv = lax.rsqrt(jnp.maximum(jnp.sum(xf * xf, axis=-1, keepdims=True), 1e-16))
        logits = s * x_inv                             # cosine/T, bounded in [-1/T, 1/T] -> no max-sub
        lane = lax.broadcasted_iota(jnp.int32, logits.shape, 1)
        e = jnp.where(lane < num_head, jnp.exp(logits), 0.0)
        denom = jnp.sum(e, axis=-1, keepdims=True)
        r = pl.reciprocal(denom, approx=True)
        r = r * (2.0 - denom * r)                      # one Newton step: f32 accuracy, no divide
        w_scr[...] = e * r                             # softmax over heads     [tm, Hc]
        acc_scr[...] = xf                              # residual accumulator   [tm, Dp]

    # ---- per-head transform: one square MXU call + FMA into the accumulator ----------------
    y = jnp.dot(x, wt_ref[...], preferred_element_type=jnp.float32)               # [tm, Dp]
    y = y + b_ref[...].astype(jnp.float32)
    lane = lax.broadcasted_iota(jnp.int32, w_scr.shape, 1)
    wh = jnp.sum(jnp.where(lane == h, w_scr[...], 0.0), axis=-1, keepdims=True)   # this head's weight
    acc_scr[...] = acc_scr[...] + wh * y

    @pl.when(h == num_head - 1)
    def _():
        o_ref[...] = acc_scr[...].astype(o_ref.dtype)


def prepare_feature_adapter_params(P, W, b, *, temperature=4.0, compute_dtype=jnp.float32):
    """Hoisted parameter prep: run once per weight update, NOT per forward call."""
    H, D = P.shape
    Dp = ((D + 127) // 128) * 128
    Hc = ((H + 127) // 128) * 128
    pad_d = Dp - D
    eps = 1e-8

    # prototypes: pre-normalize, fold softmax temperature, pad to a full 128-lane block
    Pf = P.astype(jnp.float32)
    p_norm = jnp.maximum(jnp.sqrt(jnp.sum(Pf * Pf, axis=-1, keepdims=True)), eps)
    P_hat = (Pf / p_norm) * (1.0 / temperature)                                    # [H, D]
    pT = jnp.zeros((Dp, Hc), jnp.float32).at[:D, :H].set(P_hat.T).astype(compute_dtype)

    # per-head transposed weights (PyTorch Linear stores [out, in]) and biases, zero-padded,
    # cast to the compute dtype so the MXU sees matched operands (native bf16 path for bf16 x).
    W_p = jnp.pad(W, ((0, 0), (0, pad_d), (0, pad_d))) if pad_d else W
    Wt = jnp.transpose(W_p, (0, 2, 1)).astype(compute_dtype)                       # [H, Dp, Dp]
    b_p = jnp.pad(b, ((0, 0), (0, pad_d))) if pad_d else b
    b3 = b_p.reshape(H, 1, Dp).astype(compute_dtype)                               # [H, 1, Dp]
    return pT, Wt, b3


def feature_adapter_apply(x, params, *, row_tile=None):
    pT, Wt, b3 = params
    H, _, Dp = Wt.shape
    Hc = pT.shape[1]
    orig_shape = x.shape
    D = orig_shape[-1]
    x2 = x.reshape(-1, D)
    N = x2.shape[0]
    cdt = x.dtype

    # ---- adaptive row tile: fill the MXU, keep f32 temps/tiles in budget, and keep >= 2 row
    # tiles so the "parallel" axis can span both v7x TensorCores ------------------------------
    if row_tile is None:
        row_tile = 512 if Dp <= 512 else (256 if Dp <= 2048 else 128)
    tm = max(8, min(((row_tile + 7) // 8) * 8, ((N + 7) // 8) * 8))
    if N > 8 and pl.cdiv(N, tm) < 2:
        tm = max(8, ((pl.cdiv(N, 2) + 7) // 8) * 8)
    N_pad = pl.cdiv(N, tm) * tm

    pad_d = Dp - D
    pad_n = N_pad - N
    # TODO(synk): handle the final partial row tile in-kernel (masked store) instead of jnp.pad.
    if pad_n or pad_d:
        x2 = jnp.pad(x2, ((0, pad_n), (0, pad_d)))

    # ---- per-generation VMEM budget: ~85% of physical (headroom for Mosaic internal scratch,
    # matters most on v7x's 64 MiB parts; lets v5e/v6e use their full 128 MiB) -----------------
    try:
        vmem_phys = pltpu.get_tpu_info().vmem_capacity_bytes
    except Exception:
        vmem_phys = 64 * 1024 * 1024
    cap = int(vmem_phys * 85 // 100)
    isz = jnp.dtype(cdt).itemsize
    need = (4 * tm * Dp * isz              # x + out tiles, double-buffered
            + 2 * Dp * Dp * isz            # streamed per-head weight block, double-buffered
            + 2 * (Dp * Hc + Dp) * isz     # resident prototypes + per-head bias
            + tm * (Dp + Hc) * 4           # accumulator + softmax scratch (f32)
            + 4 * tm * Dp * 4)             # in-kernel f32 temporaries
    vmem_limit = int(min(max(need * 5 // 4, 32 * 1024 * 1024), cap))
    # TODO(synk): for very large feature dims where one head's [Dp, Dp] block exceeds the budget,
    # stream 512-1024 column chunks per grid step instead of whole heads.

    kernel = lambda *refs: _feature_adapter_kernel(*refs, num_head=H)

    out = pl.pallas_call(
        kernel,
        out_shape=jax.ShapeDtypeStruct((N_pad, Dp), cdt),
        grid_spec=pltpu.PrefetchScalarGridSpec(
            num_scalar_prefetch=0,
            grid=(N_pad // tm, H),
            in_specs=[
                pl.BlockSpec((tm, Dp), lambda i, h: (i, 0)),            # x tile (constant over h)
                pl.BlockSpec((Dp, Hc), lambda i, h: (0, 0)),            # normalized prototypes (small, resident)
                pl.BlockSpec((None, Dp, Dp), lambda i, h: (h, 0, 0)),   # head h weight^T (streamed)
                pl.BlockSpec((None, 1, Dp), lambda i, h: (h, 0, 0)),    # head h bias (streamed)
            ],
            out_specs=pl.BlockSpec((tm, Dp), lambda i, h: (i, 0)),
            scratch_shapes=[
                pltpu.VMEM((tm, Hc), jnp.float32),    # softmax head weights
                pltpu.VMEM((tm, Dp), jnp.float32),    # residual accumulator
            ],
        ),
        compiler_params=pltpu.CompilerParams(
            dimension_semantics=("parallel", "arbitrary"),
            vmem_limit_bytes=vmem_limit,
        ),
    )(x2, pT, Wt, b3)

    return out[:N, :D].reshape(orig_shape)


def feature_adapter(x, P, W, b, *, temperature=4.0, row_tile=None):
    """Convenience one-shot wrapper. For repeated forward calls, prepare params once and reuse."""
    params = prepare_feature_adapter_params(P, W, b, temperature=temperature, compute_dtype=x.dtype)
    return feature_adapter_apply(x, params, row_tile=row_tile)


def _reference(x, P, W, b, temperature):
    eps = 1e-8
    orig = x.shape
    x2 = x.reshape(-1, orig[-1]).astype(jnp.float32)
    xn = jnp.maximum(jnp.linalg.norm(x2, axis=-1, keepdims=True), eps)
    pn = jnp.maximum(jnp.linalg.norm(P, axis=-1, keepdims=True), eps)
    scores = (x2 @ P.T) / xn / pn.T
    w = jax.nn.softmax(scores / temperature, axis=-1)
    out = x2
    for h in range(P.shape[0]):
        out = out + w[:, h:h + 1] * (x2 @ W[h].T + b[h][None, :])
    return out.reshape(orig)


if __name__ == "__main__":
    key = jax.random.PRNGKey(0)
    B, S, D, H = 2, 8, 32, 4
    temperature = 4.0

    k_x, k_p, k_w, k_b = jax.random.split(key, 4)

    # deterministic parameter init (mimicking kaiming_uniform / Linear default bounds)
    bound_p = math.sqrt(1.0 / D)          # kaiming_uniform(a=sqrt(5)) on [H, D]
    P = jax.random.uniform(k_p, (H, D), jnp.float32, -bound_p, bound_p)
    bound_w = 1.0 / math.sqrt(D)
    W = jax.random.uniform(k_w, (H, D, D), jnp.float32, -bound_w, bound_w)   # [out, in] per head
    b = jax.random.uniform(k_b, (H, D), jnp.float32, -bound_w, bound_w)

    # 3-D input [B, S, D]
    x3 = jax.random.normal(k_x, (B, S, D), jnp.float32)
    out3 = jax.block_until_ready(feature_adapter(x3, P, W, b, temperature=temperature))
    ref3 = _reference(x3, P, W, b, temperature)
    assert out3.shape == x3.shape
    assert jnp.allclose(out3, ref3, atol=1e-4, rtol=1e-4), float(jnp.max(jnp.abs(out3 - ref3)))

    # 2-D input [B, D]
    x2 = jax.random.normal(jax.random.PRNGKey(1), (B, D), jnp.float32)
    out2 = jax.block_until_ready(feature_adapter(x2, P, W, b, temperature=temperature))
    ref2 = _reference(x2, P, W, b, temperature)
    assert out2.shape == x2.shape
    assert jnp.allclose(out2, ref2, atol=1e-4, rtol=1e-4), float(jnp.max(jnp.abs(out2 - ref2)))

    print("KERNEL_OK")
</pallas_src>

<mosaic_0001>
module attributes {stable_mosaic.version = 11 : i64} {
  func.func @_lambda_(%arg0: i32, %arg1: i32, %arg2: memref<8x128xf32, #tpu.memory_space<vmem>>, %arg3: memref<128x128xf32, #tpu.memory_space<vmem>>, %arg4: memref<1x128x128xf32, #tpu.memory_space<vmem>>, %arg5: memref<1x1x128xf32, #tpu.memory_space<vmem>>, %arg6: memref<8x128xf32, #tpu.memory_space<vmem>>, %arg7: memref<8x128xf32, #tpu.memory_space<vmem>>, %arg8: memref<8x128xf32, #tpu.memory_space<vmem>>) attributes {dimension_semantics = [#tpu.dimension_semantics<parallel>, #tpu.dimension_semantics<arbitrary>], iteration_bounds = array<i64: 2, 4>, scalar_prefetch = 0 : i64, scratch_operands = 2 : i64, tpu.core_type = #tpu.core_type<tc>, window_params = [{transform_indices = @transform_0, window_bounds = array<i64: 8, 128>}, {pipeline_mode = #tpu.pipeline_mode<synchronous>, transform_indices = @transform_1, window_bounds = array<i64: 128, 128>}, {transform_indices = @transform_2, window_bounds = array<i64: 1, 128, 128>}, {transform_indices = @transform_3, window_bounds = array<i64: 1, 1, 128>}, {transform_indices = @transform_4, window_bounds = array<i64: 8, 128>}]} {
    %c0 = arith.constant 0 : index
    %c0_0 = arith.constant 0 : index
    %0 = vector.load %arg2[%c0, %c0_0] : memref<8x128xf32, #tpu.memory_space<vmem>>, vector<8x128xf32>
    %c0_i32 = arith.constant 0 : i32
    %1 = arith.cmpi eq, %arg1, %c0_i32 : i32
    %2 = arith.extui %1 : i1 to i32
    %c0_i32_1 = arith.constant 0 : i32
    %3 = arith.cmpi ne, %2, %c0_i32_1 : i32
    scf.if %3 {
      %c0_17 = arith.constant 0 : index
      %c0_18 = arith.constant 0 : index
      %27 = vector.load %arg3[%c0_17, %c0_18] : memref<128x128xf32, #tpu.memory_space<vmem>>, vector<128x128xf32>
      %cst_19 = arith.constant dense<0.000000e+00> : vector<8x128xf32>
      %28 = tpu.matmul %0, %27, %cst_19 {dimension_numbers = #tpu.dot_dimension_numbers<[1], [0], [0], [1], [0, 0, 1, 1], [], []>} : vector<8x128xf32>, vector<128x128xf32>, vector<8x128xf32> -> vector<8x128xf32>
      %29 = arith.mulf %0, %0 : vector<8x128xf32>
      %cst_20 = arith.constant dense<0.000000e+00> : vector<8xf32>
      %30 = vector.multi_reduction <add>, %29, %cst_20 [1] : vector<8x128xf32> to vector<8xf32>
      %31 = vector.shape_cast %30 : vector<8xf32> to vector<8x1xf32>
      %cst_21 = arith.constant 1.000000e-16 : f32
      %32 = vector.broadcast %cst_21 : f32 to vector<8x1xf32>
      %33 = arith.maximumf %31, %32 : vector<8x1xf32>
      %34 = math.rsqrt %33 : vector<8x1xf32>
      %35 = vector.broadcast %34 : vector<8x1xf32> to vector<8x128xf32>
      %36 = arith.mulf %28, %35 : vector<8x128xf32>
      %37 = tpu.iota {dimensions = array<i32: 1>} : vector<8x128xi32>
      %c4_i32 = arith.constant 4 : i32
      %38 = vector.broadcast %c4_i32 : i32 to vector<8x128xi32>
      %39 = arith.cmpi slt, %37, %38 : vector<8x128xi32>
      %40 = math.exp %36 : vector<8x128xf32>
      %cst_22 = arith.constant 0.000000e+00 : f32
      %41 = vector.broadcast %cst_22 : f32 to vector<8x128xf32>
      %42 = arith.select %39, %40, %41 : vector<8x128xi1>, vector<8x128xf32>
      %cst_23 = arith.constant dense<0.000000e+00> : vector<8xf32>
      %43 = vector.multi_reduction <add>, %42, %cst_23 [1] : vector<8x128xf32> to vector<8xf32>
      %44 = vector.shape_cast %43 : vector<8xf32> to vector<8x1xf32>
      %45 = tpu.reciprocal %44 {approx = true} : vector<8x1xf32> -> vector<8x1xf32>
      %46 = arith.mulf %44, %45 : vector<8x1xf32>
      %cst_24 = arith.constant 2.000000e+00 : f32
      %47 = vector.broadcast %cst_24 : f32 to vector<8x1xf32>
      %48 = arith.subf %47, %46 : vector<8x1xf32>
      %49 = arith.mulf %45, %48 : vector<8x1xf32>
      %50 = vector.broadcast %49 : vector<8x1xf32> to vector<8x128xf32>
      %51 = arith.mulf %42, %50 : vector<8x128xf32>
      %c0_25 = arith.constant 0 : index
      %c0_26 = arith.constant 0 : index
      %52 = vector.load %arg7[%c0_25, %c0_26] : memref<8x128xf32, #tpu.memory_space<vmem>>, vector<8x128xf32>
      tpu.vector_store %arg7[%c0_25, %c0_26], %51 {strides = array<i32>} : memref<8x128xf32, #tpu.memory_space<vmem>>, vector<8x128xf32>,
      %c0_27 = arith.constant 0 : index
      %c0_28 = arith.constant 0 : index
      %53 = vector.load %arg8[%c0_27, %c0_28] : memref<8x128xf32, #tpu.memory_space<vmem>>, vector<8x128xf32>
      tpu.vector_store %arg8[%c0_27, %c0_28], %0 {strides = array<i32>} : memref<8x128xf32, #tpu.memory_space<vmem>>, vector<8x128xf32>,
    } else {
    }
    %c0_2 = arith.constant 0 : index
    %c0_3 = arith.constant 0 : index
    %c0_4 = arith.constant 0 : index
    %4 = vector.load %arg4[%c0_2, %c0_3, %c0_4] : memref<1x128x128xf32, #tpu.memory_space<vmem>>, vector<1x128x128xf32>
    %5 = vector.shape_cast %4 : vector<1x128x128xf32> to vector<128x128xf32>
    %cst = arith.constant dense<0.000000e+00> : vector<8x128xf32>
    %6 = tpu.matmul %0, %5, %cst {dimension_numbers = #tpu.dot_dimension_numbers<[1], [0], [0], [1], [0, 0, 1, 1], [], []>} : vector<8x128xf32>, vector<128x128xf32>, vector<8x128xf32> -> vector<8x128xf32>
    %c0_5 = arith.constant 0 : index
    %c0_6 = arith.constant 0 : index
    %c0_7 = arith.constant 0 : index
    %7 = vector.load %arg5[%c0_5, %c0_6, %c0_7] : memref<1x1x128xf32, #tpu.memory_space<vmem>>, vector<1x1x128xf32>
    %8 = vector.shape_cast %7 : vector<1x1x128xf32> to vector<1x128xf32>
    %9 = vector.broadcast %8 : vector<1x128xf32> to vector<8x128xf32>
    %10 = arith.addf %6, %9 : vector<8x128xf32>
    %11 = tpu.iota {dimensions = array<i32: 1>} : vector<8x128xi32>
    %12 = vector.broadcast %arg1 : i32 to vector<8x128xi32>
    %13 = arith.cmpi eq, %11, %12 : vector<8x128xi32>
    %c0_8 = arith.constant 0 : index
    %c0_9 = arith.constant 0 : index
    %14 = vector.load %arg7[%c0_8, %c0_9] : memref<8x128xf32, #tpu.memory_space<vmem>>, vector<8x128xf32>
    %cst_10 = arith.constant 0.000000e+00 : f32
    %15 = vector.broadcast %cst_10 : f32 to vector<8x128xf32>
    %16 = arith.select %13, %14, %15 : vector<8x128xi1>, vector<8x128xf32>
    %cst_11 = arith.constant dense<0.000000e+00> : vector<8xf32>
    %17 = vector.multi_reduction <add>, %16, %cst_11 [1] : vector<8x128xf32> to vector<8xf32>
    %18 = vector.shape_cast %17 : vector<8xf32> to vector<8x1xf32>
    %c0_12 = arith.constant 0 : index
    %c0_13 = arith.constant 0 : index
    %19 = vector.load %arg8[%c0_12, %c0_13] : memref<8x128xf32, #tpu.memory_space<vmem>>, vector<8x128xf32>
    %20 = vector.broadcast %18 : vector<8x1xf32> to vector<8x128xf32>
    %21 = arith.mulf %20, %10 : vector<8x128xf32>
    %22 = arith.addf %19, %21 : vector<8x128xf32>
    %c0_14 = arith.constant 0 : index
    %c0_15 = arith.constant 0 : index
    %23 = vector.load %arg8[%c0_14, %c0_15] : memref<8x128xf32, #tpu.memory_space<vmem>>, vector<8x128xf32>
    tpu.vector_store %arg8[%c0_14, %c0_15], %22 {strides = array<i32>} : memref<8x128xf32, #tpu.memory_space<vmem>>, vector<8x128xf32>,
    %c3_i32 = arith.constant 3 : i32
    %24 = arith.cmpi eq, %arg1, %c3_i32 : i32
    %25 = arith.extui %24 : i1 to i32
    %c0_i32_16 = arith.constant 0 : i32
    %26 = arith.cmpi ne, %25, %c0_i32_16 : i32
    scf.if %26 {
      %c0_17 = arith.constant 0 : index
      %c0_18 = arith.constant 0 : index
      %27 = vector.load %arg8[%c0_17, %c0_18] : memref<8x128xf32, #tpu.memory_space<vmem>>, vector<8x128xf32>
      %c0_19 = arith.constant 0 : index
      %c0_20 = arith.constant 0 : index
      %28 = vector.load %arg6[%c0_19, %c0_20] : memref<8x128xf32, #tpu.memory_space<vmem>>, vector<8x128xf32>
      tpu.vector_store %arg6[%c0_19, %c0_20], %27 {strides = array<i32>} : memref<8x128xf32, #tpu.memory_space<vmem>>, vector<8x128xf32>,
    } else {
    }
    return
  }
  func.func @transform_0(%arg0: i32, %arg1: i32) -> (i32, i32) {
    %c0_i32 = arith.constant 0 : i32
    %c0_i32_0 = arith.constant 0 : i32
    return %arg0, %c0_i32 : i32, i32
  }
  func.func @transform_1(%arg0: i32, %arg1: i32) -> (i32, i32) {
    %c0_i32 = arith.constant 0 : i32
    %c0_i32_0 = arith.constant 0 : i32
    %c0_i32_1 = arith.constant 0 : i32
    return %c0_i32, %c0_i32_0 : i32, i32
  }
  func.func @transform_2(%arg0: i32, %arg1: i32) -> (i32, i32, i32) {
    %c0_i32 = arith.constant 0 : i32
    %c0_i32_0 = arith.constant 0 : i32
    %c0_i32_1 = arith.constant 0 : i32
    return %arg1, %c0_i32, %c0_i32_0 : i32, i32, i32
  }
  func.func @transform_3(%arg0: i32, %arg1: i32) -> (i32, i32, i32) {
    %c0_i32 = arith.constant 0 : i32
    %c0_i32_0 = arith.constant 0 : i32
    %c0_i32_1 = arith.constant 0 : i32
    return %arg1, %c0_i32, %c0_i32_0 : i32, i32, i32
  }
  func.func @transform_4(%arg0: i32, %arg1: i32) -> (i32, i32) {
    %c0_i32 = arith.constant 0 : i32
    %c0_i32_0 = arith.constant 0 : i32
    return %arg0, %c0_i32 : i32, i32
  }
}

</mosaic_0001>

<bundles_post_ra>
// kernel: tpu_custom_call.1
= control target key start
LH: loop header
LB: loop body
LE: loop exit
PB: predicated region body
PF: predicated region fallthrough
CT: control target
= control target key end

     0   :  { %s1600_s0 = inlined_call_operand.hbm [shape: f32[16,128], index: 0, kind: input, shape index: {}]   ;;  %s1601_s1 = inlined_call_operand.hbm [shape: f32[128,128], index: 1, kind: input, shape index: {}]   ;;  %s1602_s2 = inlined_call_operand.hbm [shape: f32[4,128,128], index: 2, kind: input, shape index: {}]   ;;  %s1603_s3 = inlined_call_operand.vmem [shape: f32[4,1,128], index: 3, kind: input, shape index: {}]   ;;  %s1604_s4 = inlined_call_operand.hbm [shape: f32[16,128], index: 4, kind: output, shape index: {}]  }
   0x1   :  { %1620 = sst [smem:[#allocation25_spill]] %s1600_s0 }
   0x2   :  { %9 = vsyncpa [#allocation5], 0 }
   0x3   :  { %11 = vsyncpa [#allocation5 + $0x1], 0 }
   0x4   :  { %12 = vsyncpa [#allocation8], 0 }
   0x5   :  { %13 = vsyncpa [#allocation6], 0 }
   0x6   :  { %15 = vsyncpa [#allocation6 + $0x1], 0  ;;  %s1212_s15 = smov 0   ;;  %s1214_s16 = smov 0  }
   0x7   :  { %s1216_s17 = smov 0   ;;  %s1218_s18 = smov 0  }
   0x8   :  { %s1220_s19 = smov 0   ;;  %s1222_s20 = smov 0  }
   0x9   :  { %s1224_s21 = smov 0   ;;  %s1226_s22 = smov 0  }
   0xa   :  { %s1228_s23 = smov 0   ;;  %s1230_s24 = smov 0  }
   0xb   :  { %s1232_s25 = smov 0  }
   0xc LB: > { %1621 = sst [smem:[#allocation15_spill]] %s1141_s17  ;;  %s1268_s26 = sadd.s32 4294967295, %s1173_s25   ;;  %s1173_s25 = sphi %s1232_s25, %s21_s25   ;;  %s1169_s24 = sphi %s1230_s24, %s1661_s24   ;;  %s1165_s23 = sphi %s1228_s23, %s1660_s23   ;;  %s1161_s22 = sphi %s1226_s22, %s1659_s22   ;;  %s1157_s21 = sphi %s1224_s21, %s1658_s21   ;;  %s1153_s20 = sphi %s1222_s20, %s1657_s20   ;;  %s1149_s19 = sphi %s1220_s19, %s1665_s19   ;;  %s1145_s18 = sphi %s1218_s18, %s1664_s18   ;;  %s1141_s17 = sphi %s1216_s17, %s1655_s17   ;;  %s1137_s16 = sphi %s1214_s16, %s1663_s16   ;;  %s1133_s15 = sphi %s1212_s15, %s1662_s15  }
   0xd   : > { %1622 = sst [smem:[#allocation16_spill]] %s1145_s18  ;;  %s649_s27 = sadd.s32 4294967294, %s1173_s25  }
   0xe   : > { %1623 = sst [smem:[#allocation17_spill]] %s1153_s20  ;;  %s30_s28 = sadd.s32 1, %s1165_s23 }
   0xf   : > { %1624 = sst [smem:[#allocation18_spill]] %s1165_s23  ;;  %s33_s29 = sadd.s32 1, %s1169_s24 }
  0x10   : > { %1625 = sst [smem:[#allocation19_spill]] %s1169_s24  ;;  %p31_p0 = scmp.ge.s32.totalorder %s30_s28, 4 }
  0x11   : > { %s40_s30 = sadd.s32 1, %s1153_s20  ;;  %p47_p1 = scmp.ne.s32.totalorder %s1153_s20, %s1149_s19 }
  0x12   : > { %p48_p2 = scmp.eq.s32.totalorder %s1173_s25, 0  ;;  %s1667_s28 = smov (%p31_p0, %s30_s28), 0 }
  0x13   : > { %1626 = sst [smem:[#allocation20_spill]] %s1667_s28  ;;  %s1669_s29 = smov (!%p31_p0, %s33_s29), %s1169_s24 }
  0x14   : > { %p1285_p3 = por %p48_p2, %p47_p1  ;;  %p1607_p4 = scmp.ne.s32.totalorder %s1149_s19, %s1145_s18 }
  0x15   : > { %p35_p5 = scmp.ge.s32.totalorder %s1669_s29, 2  ;;  %s84_s6 = ssub.s32 %s1165_s23, %s1667_s28 }
  0x16   : > { %p85_p6 = scmp.eq.s32.totalorder %s84_s6, 0  ;;  %s87_s7 = sadd.s32 1, %s1141_s17 }
  0x17   : > { %s1671_s29 = smov (%p35_p5, %s1669_s29), 0  ;;  %p94_p7 = scmp.ne.s32.totalorder %s1141_s17, %s1137_s16 }
  0x18   : > { %1628 = sst [smem:[#allocation21_spill]] %s1671_s29  ;;  %s37_s9 = ssub.s32 %s1169_s24, %s1671_s29 }
  0x19   : > { %s1297_s8 = scalar_select %p85_p6, %s1141_s17, %s87_s7  }
  0x1a   : > { %p38_p8 = scmp.eq.s32.totalorder %s37_s9, 0  ;;  %p1307_p10 = por %p94_p7, %p48_p2 }
  0x1b   : > { %1629 = sst [smem:[#allocation22_spill]] %s1297_s8  ;;  %p150_p11 = scmp.eq.s32.totalorder %s1268_s26, 7 }
  0x1c   : > { %s1313_s11 = scalar_select %p38_p8, %s1153_s20, %s40_s30  }
  0x1d   : > { %p1318_p12 = por %p150_p11, %p47_p1  ;;  %p156_p13 = scmp.eq.s32.totalorder %s649_s27, 7 }
  0x1e   : > { %1631 = sst [smem:[#allocation23_spill]] %s1313_s11  ;;  %p849_p5 = scmp.lt.s32.totalorder %s1173_s25, 8 }
  0x1f   : > { %s1632_s12 = scalar_select %p1318_p12, 1, 0 }
  0x20   : > { %p1325_p0 = por %p156_p13, %p1607_p4  ;;  %s189_s14 = sand.u32 1, %s1173_s25  }
  0x21   : > { %s191_s6 = sand.u32 1, %s1153_s20   ;;  %s654_s9 = sshll.u32 %s1169_s24, 7 }
  0x22   : > { %s1633_s13 = scalar_select %p1325_p0, 1, 0 }
  0x23   : > { %s653_s7 = sshll.u32 %s191_s6, 3  ;;  %s1635_s0 = sld [smem:[#allocation25_spill]] }
  0x24   : > { %1634 = sst [smem:[#allocation24_spill]] %s1633_s13  ;;  %s193_s27 = scalar_lea.vmem [#allocation4], %s653_s7 }
  0x25   : > { %s200_s11 = sshll.u32 %s193_s27, 4  ;;  %p1342_p1 = pnand %p849_p5, %p1285_p3  ;;  %s1338_s11 = int_to_ptr.vmem [resolvable:$true] %s200_s11 }
  0x26   : > { %p1348_p2 = pnand %p849_p5, %p1307_p10  ;;  %s1352_s29 = scalar_lea.sflag [#allocation5], %s189_s14 }
  0x27   : > { %p957_p7 = pneg %p1342_p1 }
  0x28   : > { %s1637_s28 = scalar_select %p1348_p2, 1, 0 }
  0x29   : > { %s1336_s30 = scalar_lea.hbm %s1635_s0, %s654_s9  ;;  %s960_s10 = scalar_lea.hbm %s1635_s0, 256 }
  0x2a   : > { %s955_s6 = scalar_lea.hbm %s1336_s30, 128  ;;  %p961_p10 = scmp.lt.u32.totalorder %s1336_s30, %s1635_s0 }
  0x2b   : > { %p956_p6 = scmp.ne.s32.totalorder %s1336_s30, %s955_s6  ;;  %p962_p11 = scmp.lt.u32.totalorder %s960_s10, %s955_s6 }
  0x2c   : > { %p964_p5 = scmp.lt.u32.totalorder %s955_s6, %s1336_s30 }
  0x2d   : > { %p958_p8 = pnand %p957_p7, %p956_p6  ;;  %p963_p13 = por %p962_p11, %p961_p10 }
  0x2f   : > { %p959_p3 = pneg %p958_p8  ;;  %p965_p9 = por %p964_p5, %p963_p13 }
  0x31   : > { %p966_p4 = pnand %p965_p9, %p959_p3 }
  0x33   : > { %969 = shalt.err (!%p966_p4)
}
  0x34   : > { %s970_s14 = scalar_lea.vmem %s1338_s11, 128  ;;  %s1175_s5 = smov [#allocation4]  }
  0x35   : > { %p971_p6 = scmp.ne.s32.totalorder %s1338_s11, %s970_s14  ;;  %s975_s7 = sshll.u32 %s1175_s5, 4  ;;  %s976_s7 = int_to_ptr.vmem [resolvable:$false] %s975_s7 }
  0x36   : > { %s977_s9 = scalar_lea.vmem %s976_s7, 256  ;;  %p978_p12 = scmp.lt.s32.totalorder %s1338_s11, %s976_s7 }
  0x37   : > { %p973_p8 = pnand %p971_p6, %p957_p7  ;;  %p979_p10 = scmp.lt.s32.totalorder %s977_s9, %s970_s14 }
  0x39   : > { %p974_p0 = pneg %p973_p8  ;;  %p980_p11 = por %p979_p10, %p978_p12 }
  0x3b   : > { %p981_p13 = pnand %p980_p11, %p974_p0 }
  0x3d   : > { %984 = shalt.err (!%p981_p13)
}
  0x3e   : > { %840 = dma.hbm_to_vmem [thread:$0]  (!%p1342_p1), %s1336_s30, 128, %s1338_s11, %s1352_s29  }
  0x3f   : > { %p1614_p4 = scmp.eq.s32.totalorder %s1268_s26, 0  ;;  %p650_p9 = scmp.ge.s32.totalorder %s1173_s25, 1 }
  0x40   : > { %p163_p12 = scmp.lt.s32.totalorder %s1173_s25, 9  ;;  %p1638_p0 = scmp.ne.s32.totalorder %s1149_s19, %s1145_s18 }
  0x41   : > { %p1640_p3 = scmp.ne.s32.totalorder %s1137_s16, %s1133_s15  ;;  %s1176_s11 = smov [#allocation7]  }
  0x42   : > { %p1388_p7 = por %p1614_p4, %p1638_p0  ;;  %p1401_p6 = pnand %p650_p9, %p163_p12 }
  0x43   : > { %p1397_p5 = por %p1640_p3, %p1614_p4  ;;  %s175_s30 = sshll.u32 %s1176_s11, 4  ;;  %s176_s30 = int_to_ptr.vmem [resolvable:$true] %s175_s30 }
  0x44   : > { %s1639_s8 = scalar_select %p1388_p7, 1, 0 }
  0x45   : > { %s1641_s6 = scalar_select %p1397_p5, 1, 0 }
  0x46   : > { %s1642_s10 = scalar_select %p1401_p6, 1, 0 }
  0x47   : > { %p833_p1 = pneg %p1401_p6  ;;  %s209_s27 = sand.u32 1, %s1141_s17  }
  0x48   : > { %s655_s15 = sshll.u32 %s209_s27, 7  ;;  %s670_s5 = sshll.u32 %s1165_s23, 11 }
  0x49   : > { %p1410_p8 = pnand %p833_p1, %p1614_p4  ;;  %s1418_s0 = scalar_lea.hbm %s1602_s2, %s670_s5 }
  0x4a   : > { %s985_s11 = scalar_lea.hbm %s1601_s1, 2048 }
  0x4b   : > { %p986_p10 = scmp.ne.s32.totalorder %s1601_s1, %s985_s11  ;;  %p987_p11 = pneg %p1410_p8 }
  0x4c   : > { %p992_p12 = scmp.lt.u32.totalorder %s985_s11, %s1601_s1 }
  0x4d   : > { %p988_p13 = pnand %p987_p11, %p986_p10 }
  0x4f   : > { %p989_p9 = pneg %p988_p13 }
  0x51   : > { %p994_p0 = pnand %p992_p12, %p989_p9 }
  0x53   : > { %997 = shalt.err (!%p994_p0)
}
  0x54   : > { %s998_s5 = scalar_lea.vmem %s176_s30, 2048  ;;  %p1006_p5 = scmp.lt.s32.totalorder %s176_s30, %s176_s30 }
  0x55   : > { %p999_p3 = scmp.ne.s32.totalorder %s176_s30, %s998_s5  ;;  %p1007_p7 = scmp.lt.s32.totalorder %s998_s5, %s998_s5 }
  0x57   : > { %p1001_p1 = pnand %p999_p3, %p987_p11  ;;  %p1008_p6 = por %p1007_p7, %p1006_p5 }
  0x59   : > { %p1002_p4 = pneg %p1001_p1 }
  0x5b   : > { %p1009_p2 = pnand %p1008_p6, %p1002_p4 }
  0x5d   : > { %1012 = shalt.err (!%p1009_p2)
}
  0x5e   : > { %s1177_s18 = smov 128   ;;  %s1178_s17 = smov 8  }
  0x5f   : > { %836 = dma.hbm_to_vmem [thread:$0]  (!%p1410_p8), %s1601_s1, 2048, %s176_s30, [#allocation8], %s1177_s18, %s1177_s18, %s1178_s17  }
  0x60   : > { %s211_s13 = scalar_lea.vmem [#allocation9], %s655_s15  ;;  %s1013_s9 = scalar_lea.hbm %s1418_s0, 2048 }
  0x61   : > { %s218_s7 = sshll.u32 %s211_s13, 4  ;;  %p1014_p2 = scmp.ne.s32.totalorder %s1418_s0, %s1013_s9  ;;  %s1439_s7 = int_to_ptr.vmem [resolvable:$true] %s218_s7 }
  0x62   : > { %p1644_p4 = scmp.ne.s32.totalorder %s1637_s28, 0  ;;  %s1018_s27 = scalar_lea.hbm %s1602_s2, 8192 }
  0x63   : > { %p1019_p8 = scmp.lt.u32.totalorder %s1418_s0, %s1602_s2  ;;  %p1020_p10 = scmp.lt.u32.totalorder %s1018_s27, %s1013_s9 }
  0x64   : > { %p1015_p7 = pneg %p1644_p4  ;;  %p1022_p13 = scmp.lt.u32.totalorder %s1013_s9, %s1418_s0 }
  0x65   : > { %p1021_p11 = por %p1020_p10, %p1019_p8 }
  0x66   : > { %p1016_p5 = pnand %p1015_p7, %p1014_p2 }
  0x67   : > { %p1023_p9 = por %p1022_p13, %p1021_p11 }
  0x68   : > { %p1017_p6 = pneg %p1016_p5 }
  0x6a   : > { %p1024_p12 = pnand %p1023_p9, %p1017_p6 }
  0x6c   : > { %1027 = shalt.err (!%p1024_p12)
}
  0x6d   : > { %s1028_s30 = scalar_lea.vmem %s1439_s7, 2048  ;;  %s1179_s15 = smov [#allocation9]  }
  0x6e   : > { %p1029_p0 = scmp.ne.s32.totalorder %s1439_s7, %s1028_s30  ;;  %s1033_s20 = sshll.u32 %s1179_s15, 4  ;;  %s1034_s20 = int_to_ptr.vmem [resolvable:$false] %s1033_s20 }
  0x6f   : > { %s1035_s23 = scalar_lea.vmem %s1034_s20, 4096  ;;  %p1036_p2 = scmp.lt.s32.totalorder %s1439_s7, %s1034_s20 }
  0x70   : > { %p1031_p3 = pnand %p1029_p0, %p1015_p7  ;;  %p1037_p5 = scmp.lt.s32.totalorder %s1035_s23, %s1028_s30 }
  0x72   : > { %p1032_p1 = pneg %p1031_p3  ;;  %p1038_p8 = por %p1037_p5, %p1036_p2 }
  0x74   : > { %p1039_p10 = pnand %p1038_p8, %p1032_p1 }
  0x76   : > { %1042 = shalt.err (!%p1039_p10)
}
  0x77   : > { %843 = dma.hbm_to_vmem [thread:$0]  (!%p1644_p4), %s1418_s0, 2048, %s1439_s7, %s1352_s29, %s1177_s18, %s1177_s18, %s1178_s17  }
  0x78   : > { %p1645_p7 = scmp.ne.s32.totalorder %s1642_s10, 0 }
  0x79   : > { %s238_s24 = sand.u32 (!%p1645_p7), 1, %s1268_s26   ;;  %s240_s13 = sand.u32 (!%p1645_p7), 1, %s1149_s19  }
  0x7a   : > { %236 = sbr.rel (%p1645_p7) target bundleno = 850 (0x352), region = 36  ;;  %s1476_s9 = sshll.u32 (!%p1645_p7), %s240_s13, 3 }
  0x7b   : > { %s239_s28 = scalar_lea.sflag (!%p1645_p7), [#allocation5], %s238_s24  ;;  %s242_s14 = scalar_lea.vmem (!%p1645_p7), [#allocation4], %s1476_s9 }
  0x7c   : > { %p1646_p6 = scmp.ne.s32.totalorder (!%p1645_p7), %s1639_s8, 0 }
  0x81   : > { %1116 = dma.done.wait (%p1646_p6), %s239_s28, 128  }
  0x82   : > { %1118 = vsyncadd (%p1646_p6), %s239_s28, 4294967168  ;;  %p1647_p4 = scmp.eq.s32.totalorder %s1268_s26, 0 }
  0x84   : > { %1120 = dma.done.wait (%p1647_p4), [#allocation8], 2048   ;;  %p1648_p11 = pmov %p1647_p4 }
  0x85   : > { %s253_s0 = sand.u32 1, %s1137_s16   ;;  %p1649_p13 = scmp.ne.s32.totalorder %s1641_s6, 0 }
  0x86   : > { %1122 = vsyncadd (%p1648_p11), [#allocation8], 4294965248  ;;  %s661_s29 = sshll.u32 %s253_s0, 7 }
  0x87   : > { %s1488_s10 = scalar_lea.vmem [#allocation9], %s661_s29 }
  0x88   : > { %1124 = dma.done.wait (%p1649_p13), %s239_s28, 2048  }
  0x89   : > { %1126 = vsyncadd (%p1649_p13), %s239_s28, 4294965248  ;;  %p288_p9 = scmp.lt.s32.totalorder %s1157_s21, 3  ;;  %v1502_v0 = vld [vmem:[%s242_s14] sm:$0xff]  ;;  %s287_s7 = scalar_lea.vmem [#allocation10], %s1476_s9 }
  0x8a   : > { %p663_p12 = scmp.ne.s32.totalorder %s1157_s21, 0 }
  0x8b   : > { %s1496_s8 = scalar_select %p288_p9, %s1157_s21, 3 }
  0x8c   : > { %295 = sbr.rel (%p663_p12) target bundleno = 564 (0x234), region = 52  ;;  %v296_v1 = vld [vmem:[#allocation7] sm:$0xff] (!%p663_p12)  ;;  %v297_v2 = vld [vmem:[#allocation7 + $0x8] sm:$0xff] (!%p663_p12)  ;;  %v298_v3 = vld [vmem:[#allocation7 + $0x10] sm:$0xff] (!%p663_p12)  ;;  %v382_v4 = vmul.f32 (!%p663_p12), %v1502_v0, %v1502_v0  ;;  %402 = vst [vmem:[#allocation3] sm:$0xff] (!%p663_p12), %v1502_v0  ;;  %v1180_v5 = vmov (!%p663_p12), 0.0|0.0   ;;  %v388_v35 = vlaneseq (!%p663_p12) }
  0x8d   : > { %s290_s17 = scalar_lea.vmem %s1603_s3, %s1496_s8  ;;  %775 = vmatprep.subr.bf16.mxu0 (!%p663_p12), %v1180_v5  ;;  %v776_v6 = vpack.c.bf16 (!%p663_p12), %v297_v2, %v296_v1  ;;  %v299_v7 = vld [vmem:[#allocation7 + $0x18] sm:$0xff] (!%p663_p12)  ;;  %vm1181_vm0 = vmmov (!%p663_p12), 0   ;;  %v1182_v8 = vmov (!%p663_p12), 0.0   ;;  %v300_v10 = vld [vmem:[#allocation7 + $0x20] sm:$0xff] (!%p663_p12)  ;;  %v301_v11 = vld [vmem:[#allocation7 + $0x28] sm:$0xff] (!%p663_p12) }
  0x8e   : > { %737 = vmatprep.mubr.msk.f32.mxu0 (!%p663_p12), %vm1181_vm0, %v1182_v8  ;;  %383 = vadd.xlane.f32.xlu0 (!%p663_p12), %v382_v4  ;;  %v779_v9 = vpack.c.bf16 (!%p663_p12), %v299_v7, %v298_v3  ;;  %v782_v12 = vpack.c.bf16 (!%p663_p12), %v301_v11, %v300_v10  ;;  %v302_v13 = vld [vmem:[#allocation7 + $0x30] sm:$0xff] (!%p663_p12)  ;;  %v303_v14 = vld [vmem:[#allocation7 + $0x38] sm:$0xff] (!%p663_p12)  ;;  %v304_v16 = vld [vmem:[#allocation7 + $0x40] sm:$0xff] (!%p663_p12)  ;;  %v389_v36 = vand.u32 (!%p663_p12), 127, %v388_v35 }
  0x8f   : > { %777 = vmatpush3.bf16.msra.mxu0 (!%p663_p12), %v776_v6  ;;  %v785_v15 = vpack.c.bf16 (!%p663_p12), %v303_v14, %v302_v13  ;;  %v305_v17 = vld [vmem:[#allocation7 + $0x48] sm:$0xff] (!%p663_p12)  ;;  %v306_v19 = vld [vmem:[#allocation7 + $0x50] sm:$0xff] (!%p663_p12)  ;;  %v307_v20 = vld [vmem:[#allocation7 + $0x58] sm:$0xff] (!%p663_p12) }
  0x90   : > { %778 = vmatprep.subr.bf16.mxu0 (!%p663_p12), %v1180_v5  ;;  %v788_v18 = vpack.c.bf16 (!%p663_p12), %v305_v17, %v304_v16  ;;  %v791_v21 = vpack.c.bf16 (!%p663_p12), %v307_v20, %v306_v19  ;;  %v308_v22 = vld [vmem:[#allocation7 + $0x60] sm:$0xff] (!%p663_p12)  ;;  %v309_v23 = vld [vmem:[#allocation7 + $0x68] sm:$0xff] (!%p663_p12)  ;;  %v310_v25 = vld [vmem:[#allocation7 + $0x70] sm:$0xff] (!%p663_p12)  ;;  %vm390_vm1 = vcmp.lt.s32.totalorder (!%p663_p12), %v389_v36, 4 }
  0x91   : > { %v794_v24 = vpack.c.bf16 (!%p663_p12), %v309_v23, %v308_v22  ;;  %v311_v26 = vld [vmem:[#allocation7 + $0x78] sm:$0xff] (!%p663_p12) }
  0x92   : > { %v797_v27 = vpack.c.bf16 (!%p663_p12), %v311_v26, %v310_v25 }
  0x93   : > { %780 = vmatpush3.bf16.msra.mxu0 %v779_v9 }
  0x94   : > { %781 = vmatprep.subr.bf16.mxu0 %v1180_v5 }
  0x97   : > { %783 = vmatpush3.bf16.msra.mxu0 %v782_v12 }
  0x98   : > { %784 = vmatprep.subr.bf16.mxu0 %v1180_v5 }
  0x9b   : > { %786 = vmatpush3.bf16.msra.mxu0 %v785_v15 }
  0x9c   : > { %787 = vmatprep.subr.bf16.mxu0 %v1180_v5 }
  0x9f   : > { %789 = vmatpush3.bf16.msra.mxu0 %v788_v18 }
  0xa0   : > { %790 = vmatprep.subr.bf16.mxu0 %v1180_v5 }
  0xa3   : > { %792 = vmatpush3.bf16.msra.mxu0 %v791_v21 }
  0xa4   : > { %793 = vmatprep.subr.bf16.mxu0 %v1180_v5 }
  0xa7   : > { %795 = vmatpush3.bf16.msra.mxu0 %v794_v24 }
  0xa8   : > { %796 = vmatprep.subr.bf16.mxu0 %v1180_v5 }
  0xab   : > { %798 = vmatpush3.bf16.msra.mxu0 %v797_v27 }
  0xae   : > { %738 = vmatmul.mubr.f32.vlgmr.msra.gmra.mrb[0].mxu0 %v1502_v0 }
 0x11b   : > { %v384_v28 = vpop.xlane.xlu0 %383 }
 0x11c   : > { %v385_v29 = vmax.f32 %v384_v28, 1e-16 }
 0x11e   : > { %949 = vrsqrt.f32 %v385_v29 }
 0x128   : > { %v950_v30 = vpop.eup %949 }
 0x181   : > { %v378_v31 = vpop.f32.mrb[0].mxu0 }
 0x182   : > { %v387_v32 = vmul.f32 %v950_v30, %v378_v31  ;;  %v739_v33 = vpop.f32.mrb[1].mxu0 }
 0x184   : > { %v391_v34 = vmul.f32 1.442695, %v387_v32 }
 0x186   : > { %951 = vpow2.f32 %v391_v34 }
 0x190   : > { %v952_v37 = vpop.eup %951 }
 0x191   : > { %v393_v38 = vsel %vm390_vm1, %v952_v37, 0.0 }
 0x192   : > { %394 = vadd.xlane.f32.xlu0 %v393_v38 }
 0x21f   : > { %v395_v39 = vpop.xlane.xlu0 %394 }
 0x220   : > { %953 = vrcp.f32 %v395_v39 }
 0x22a   : > { %v954_v40 = vpop.eup %953 }
 0x22b   : > { %v397_v41 = vmul.f32 %v954_v40, %v395_v39 }
 0x22d   : > { %v398_v42 = vsub.f32 2.0, %v397_v41 }
 0x22f   : > { %v399_v43 = vmul.f32 %v954_v40, %v398_v42 }
 0x231   : > { %v400_v44 = vmul.f32 %v399_v43, %v393_v38 }
 0x233   : > { %401 = vst [vmem:[#allocation2] sm:$0xff] %v400_v44 }
 0x234 PF: > { %v403_v45 = vld [vmem:[%s1488_s10] sm:$0xff]  ;;  %v404_v46 = vld [vmem:[%s1488_s10 + $0x8] sm:$0xff]  ;;  %v405_v47 = vld [vmem:[%s1488_s10 + $0x10] sm:$0xff]  ;;  %v496_v48 = vlaneseq  ;;  %v1183_v49 = vmov 0.0|0.0   ;;  %vm1184_vm2 = vmmov 0   ;;  %v1185_v52 = vmov 0.0  }
 0x235   : > { %799 = vmatprep.subr.bf16.mxu0 %v1183_v49  ;;  %v800_v50 = vpack.c.bf16 %v404_v46, %v403_v45  ;;  %v406_v51 = vld [vmem:[%s1488_s10 + $0x18] sm:$0xff]  ;;  %772 = vmatprep.mubr.msk.f32.mxu0 %vm1184_vm2, %v1185_v52  ;;  %v498_v53 = vstv %s1157_s21  ;;  %v407_v56 = vld [vmem:[%s1488_s10 + $0x20] sm:$0xff]  ;;  %v408_v57 = vld [vmem:[%s1488_s10 + $0x28] sm:$0xff]  ;;  %p665_p0 = scmp.ne.s32.totalorder %s1157_s21, 3 }
 0x236   : > { %v497_v54 = vand.u32 127, %v496_v48  ;;  %v803_v55 = vpack.c.bf16 %v406_v51, %v405_v47  ;;  %v806_v60 = vpack.c.bf16 %v408_v57, %v407_v56  ;;  %v409_v61 = vld [vmem:[%s1488_s10 + $0x30] sm:$0xff]  ;;  %v410_v62 = vld [vmem:[%s1488_s10 + $0x38] sm:$0xff]  ;;  %v411_v1 = vld [vmem:[%s1488_s10 + $0x40] sm:$0xff] }
 0x237   : > { %801 = vmatpush3.bf16.msra.mxu0 %v800_v50  ;;  %v809_v63 = vpack.c.bf16 %v410_v62, %v409_v61  ;;  %v412_v2 = vld [vmem:[%s1488_s10 + $0x48] sm:$0xff]  ;;  %v413_v4 = vld [vmem:[%s1488_s10 + $0x50] sm:$0xff]  ;;  %v414_v5 = vld [vmem:[%s1488_s10 + $0x58] sm:$0xff] }
 0x238   : > { %802 = vmatprep.subr.bf16.mxu0 %v1183_v49  ;;  %vm499_vm3 = vcmp.eq.s32.totalorder %v497_v54, %v498_v53  ;;  %v812_v3 = vpack.c.bf16 %v412_v2, %v411_v1  ;;  %v815_v6 = vpack.c.bf16 %v414_v5, %v413_v4  ;;  %v415_v7 = vld [vmem:[%s1488_s10 + $0x60] sm:$0xff]  ;;  %v416_v8 = vld [vmem:[%s1488_s10 + $0x68] sm:$0xff]  ;;  %v417_v10 = vld [vmem:[%s1488_s10 + $0x70] sm:$0xff] }
 0x239   : > { %v818_v9 = vpack.c.bf16 %v416_v8, %v415_v7  ;;  %v418_v11 = vld [vmem:[%s1488_s10 + $0x78] sm:$0xff]  ;;  %v664_v13 = vld [vmem:[%s290_s17] ss:$0 sm:$0xff]  ;;  %v504_v18 = vld [vmem:[#allocation3] sm:$0xff] }
 0x23a   : > { %v500_v58 = vld [vmem:[#allocation2] sm:$0xff]  ;;  %v821_v12 = vpack.c.bf16 %v418_v11, %v417_v10 }
 0x23b   : > { %v501_v59 = vsel %vm499_vm3, %v500_v58, 0.0  ;;  %804 = vmatpush3.bf16.msra.mxu0 %v803_v55 }
 0x23c   : > { %502 = vadd.xlane.f32.xlu0 %v501_v59  ;;  %805 = vmatprep.subr.bf16.mxu0 %v1183_v49 }
 0x23f   : > { %807 = vmatpush3.bf16.msra.mxu0 %v806_v60 }
 0x240   : > { %808 = vmatprep.subr.bf16.mxu0 %v1183_v49 }
 0x243   : > { %810 = vmatpush3.bf16.msra.mxu0 %v809_v63 }
 0x244   : > { %811 = vmatprep.subr.bf16.mxu0 %v1183_v49 }
 0x247   : > { %813 = vmatpush3.bf16.msra.mxu0 %v812_v3 }
 0x248   : > { %814 = vmatprep.subr.bf16.mxu0 %v1183_v49 }
 0x24b   : > { %816 = vmatpush3.bf16.msra.mxu0 %v815_v6 }
 0x24c   : > { %817 = vmatprep.subr.bf16.mxu0 %v1183_v49 }
 0x24f   : > { %819 = vmatpush3.bf16.msra.mxu0 %v818_v9 }
 0x250   : > { %820 = vmatprep.subr.bf16.mxu0 %v1183_v49 }
 0x253   : > { %822 = vmatpush3.bf16.msra.mxu0 %v821_v12 }
 0x256   : > { %773 = vmatmul.mubr.f32.vlgmr.msra.gmra.mrb[0].mxu0 %v1502_v0 }
 0x2c9   : > { %v503_v15 = vpop.xlane.xlu0 %502 }
 0x329   : > { %v492_v14 = vpop.f32.mrb[0].mxu0 }
 0x32a   : > { %v493_v16 = vadd.f32 %v664_v13, %v492_v14  ;;  %v774_v17 = vpop.f32.mrb[1].mxu0  ;;  %511 = sbr.rel (%p665_p0) target bundleno = 825 (0x339), region = 56 }
 0x32c   : > { %v505_v19 = vmul.f32 %v503_v15, %v493_v16 }
 0x32e   : > { %v506_v20 = vadd.f32 %v505_v19, %v504_v18 }
 0x330   : > { %507 = vst [vmem:[#allocation3] sm:$0xff] %v506_v20 }
 0x337   : > { %v512_v21 = vld [vmem:[#allocation3] sm:$0xff] }
 0x338   : > { %513 = vst [vmem:[%s287_s7] sm:$0xff] %v512_v21 }
 0x339 PF: > { %s667_s27 = sshll.u32 %s1161_s22, 7  ;;  %s528_s20 = sshll.u32 %s287_s7, 4  ;;  %s529_s20 = int_to_ptr.vmem [resolvable:$true] %s528_s20 }
 0x33a   : > { %s1540_s15 = scalar_lea.hbm %s1604_s4, %s667_s27  ;;  %s515_s21 = scalar_lea.sflag [#allocation6], %s240_s13 }
 0x33b   : > { %s1043_s23 = scalar_lea.vmem %s529_s20, 128  ;;  %p1650_p1 = scmp.ne.s32.totalorder %s1632_s12, 0 }
 0x33c   : > { %p1044_p3 = scmp.ne.s32.totalorder %s529_s20, %s1043_s23  ;;  %s1186_s24 = smov [#allocation10]  }
 0x33d   : > { %s1047_s28 = sshll.u32 %s1186_s24, 4  ;;  %s1048_s28 = int_to_ptr.vmem [resolvable:$false] %s1047_s28 }
 0x33e   : > { %p1045_p2 = pnand %p1044_p3, %p1650_p1  ;;  %s1049_s14 = scalar_lea.vmem %s1048_s28, 256 }
 0x33f   : > { %p1050_p8 = scmp.lt.s32.totalorder %s529_s20, %s1048_s28  ;;  %p1051_p10 = scmp.lt.s32.totalorder %s1049_s14, %s1043_s23 }
 0x340   : > { %p1046_p5 = pneg %p1045_p2 }
 0x341   : > { %p1052_p7 = por %p1051_p10, %p1050_p8 }
 0x343   : > { %p1053_p6 = pnand %p1052_p7, %p1046_p5 }
 0x345   : > { %1056 = shalt.err (!%p1053_p6)
}
 0x346   : > { %s1057_s22 = scalar_lea.hbm %s1540_s15, 128  ;;  %s1061_s0 = scalar_lea.hbm %s1604_s4, 256 }
 0x347   : > { %p1058_p4 = scmp.ne.s32.totalorder %s1540_s15, %s1057_s22  ;;  %p1062_p9 = scmp.lt.u32.totalorder %s1540_s15, %s1604_s4 }
 0x348   : > { %p1063_p12 = scmp.lt.u32.totalorder %s1061_s0, %s1057_s22  ;;  %p1065_p3 = scmp.lt.u32.totalorder %s1057_s22, %s1540_s15 }
 0x349   : > { %p1059_p11 = pnand %p1058_p4, %p1650_p1 }
 0x34a   : > { %p1064_p0 = por %p1063_p12, %p1062_p9 }
 0x34b   : > { %p1060_p13 = pneg %p1059_p11 }
 0x34c   : > { %p1066_p2 = por %p1065_p3, %p1064_p0 }
 0x34e   : > { %p1067_p5 = pnand %p1066_p2, %p1060_p13 }
 0x350   : > { %1070 = shalt.err (!%p1067_p5)
}
 0x351   : > { %831 = dma.vmem_to_hbm [thread:$0]  (%p1650_p1), %s529_s20, 128, %s1540_s15, %s515_s21  }
 0x352 PF: > { %s1651_s8 = sld [smem:[#allocation16_spill]]  ;;  %s1652_s26 = sld [smem:[#allocation24_spill]] }
 0x353   : > { %p851_p8 = scmp.ge.s32.totalorder %s1173_s25, 2 }
 0x358   : > { %s540_s18 = sand.u32 1, %s1651_s8   ;;  %p1653_p10 = scmp.ne.s32.totalorder %s1652_s26, 0 }
 0x359   : > { %s541_s17 = scalar_lea.sflag [#allocation6], %s540_s18 }
 0x35a   : > { %p845_p7 = pnand %p851_p8, %p1653_p10 }
 0x35c   : > { %1128 = dma.done.wait (!%p845_p7), %s541_s17, 128  }
 0x35d   : > { %1130 = vsyncadd (!%p845_p7), %s541_s17, 4294967168  ;;  %s21_s25 = sadd.s32 1, %s1173_s25   ;;  %s1654_s7 = sld [smem:[#allocation15_spill]] }
 0x35e   : > { %p18_p6 = scmp.ge.s32.totalorder %s21_s25, 10   ;;  %s1655_s17 = sld [smem:[#allocation22_spill]] }
 0x35f   : > { %s1656_s12 = sld [smem:[#allocation17_spill]]  ;;  %s1657_s20 = sld [smem:[#allocation23_spill]] }
 0x360   : > { %s1658_s21 = sld [smem:[#allocation18_spill]]  ;;  %s1659_s22 = sld [smem:[#allocation19_spill]] }
 0x361   : > { %s1660_s23 = sld [smem:[#allocation20_spill]]  ;;  %s1661_s24 = sld [smem:[#allocation21_spill]] }
 0x362   : > { %s1662_s15 = smov %s1137_s16  ;;  %s1664_s18 = smov %s1149_s19 }
 0x363   : > { %s1663_s16 = smov %s1654_s7  ;;  %20 = sbr.rel (!%p18_p6) target bundleno = 12 (0xc), region = 107 }
 0x365   : > { %s1665_s19 = smov %s1656_s12 }
 0x36a   :  { %546 = vsyncpa [#allocation5], 1 }
 0x36b   :  { %548 = vsyncpa [#allocation5 + $0x1], 1 }
 0x36c   :  { %549 = vsyncpa [#allocation8], 1 }
 0x36d   :  { %550 = vsyncpa [#allocation6], 1 }
 0x36e   :  { %552 = vsyncpa [#allocation6 + $0x1], 1 }

</bundles_post_ra>
